<compile_context>
chip_gen: v5e
topology: v5e:2x2
jax: 0.10.0
libtpu: 0.0.40
codegen_flags: <defaults>
</compile_context>

<pallas_src>
import jax
import jax.numpy as jnp
from jax import lax
from jax.experimental import pallas as pl
from jax.experimental.pallas import tpu as pltpu

KERNEL = 3
STRIDE = 3                 # nn.MaxPool2d default stride == kernel_size
LANE = 128
MAX_TILE_M = 512 * LANE    # 65536 lanes/step: 9 * 64K * 4B ~= 2.25 MiB input block


def _maxpool_kernel(x_ref, o_ref):
    # x_ref: (9, tm)  -- the 3x3 window taps on sublanes, flattened outputs on lanes.
    # o_ref: (1, tm)  -- lane-dense output tile (tm is a multiple of 128).
    o_ref[...] = jnp.max(x_ref[...], axis=0, keepdims=True)


def maxpool2d(x):
    """x: (N, C, H, W) -> (N, C, Ho, Wo); matches nn.MaxPool2d(3, ceil_mode=False)."""
    N, C, H, W = x.shape
    Ho = (H - KERNEL) // STRIDE + 1
    Wo = (W - KERNEL) // STRIDE + 1
    Hc, Wc = STRIDE * Ho, STRIDE * Wo
    M = N * C * Ho * Wo

    # ---- layout plumbing (XLA, not compute): build a lane-dense (K*K, M) slab ----
    # x9[3*di + dj, ((n*C + c)*Ho + i)*Wo + j] == x[n, c, 3*i + di, 3*j + dj]
    xc = x[:, :, :Hc, :Wc]
    x9 = (
        xc.reshape(N, C, Ho, KERNEL, Wo, KERNEL)
          .transpose(3, 5, 0, 1, 2, 4)              # (3, 3, N, C, Ho, Wo)
          .reshape(KERNEL * KERNEL, M)
    )

    # Lane tile: multiple of 128, capped; pad M so the grid tiles evenly and every
    # store in the kernel is an unmasked full-lane vst.
    tm = min(MAX_TILE_M, ((M + LANE - 1) // LANE) * LANE)
    Mp = ((M + tm - 1) // tm) * tm
    if Mp != M:
        x9 = jnp.pad(x9, ((0, 0), (0, Mp - M)))     # padded lanes discarded below

    out_flat = pl.pallas_call(
        _maxpool_kernel,
        out_shape=jax.ShapeDtypeStruct((1, Mp), x.dtype),
        grid=(Mp // tm,),
        in_specs=[pl.BlockSpec((KERNEL * KERNEL, tm), lambda i: (0, i))],
        out_specs=pl.BlockSpec((1, tm), lambda i: (0, i)),
        compiler_params=pltpu.CompilerParams(
            dimension_semantics=("parallel",),
            vmem_limit_bytes=32 * 1024 * 1024,
        ),
    )(x9)

    return out_flat[0, :M].reshape(N, C, Ho, Wo)


def _reference_maxpool(x):
    # Pure-JAX reference: reduce_window with window/stride 3, valid padding.
    return lax.reduce_window(
        x,
        -jnp.inf,
        lax.max,
        window_dimensions=(1, 1, KERNEL, KERNEL),
        window_strides=(1, 1, STRIDE, STRIDE),
        padding="VALID",
    )


if __name__ == "__main__":
    key = jax.random.PRNGKey(0)
    x = jax.random.normal(key, (2, 4, 16, 16), dtype=jnp.float32)

    out = maxpool2d(x)
    out = jax.block_until_ready(out)

    ref = _reference_maxpool(x)
    assert out.shape == (2, 4, 5, 5), out.shape
    assert jnp.allclose(out, ref), "mismatch vs reference max-pool"

    print("KERNEL_OK")
</pallas_src>

<mosaic_0001>
module attributes {stable_mosaic.version = 11 : i64} {
  func.func @_maxpool_kernel(%arg0: i32, %arg1: memref<9x256xf32, #tpu.memory_space<vmem>>, %arg2: memref<1x256xf32, #tpu.memory_space<vmem>>) attributes {dimension_semantics = [#tpu.dimension_semantics<parallel>], iteration_bounds = array<i64: 1>, scalar_prefetch = 0 : i64, scratch_operands = 0 : i64, tpu.core_type = #tpu.core_type<tc>, window_params = [{transform_indices = @transform_0, window_bounds = array<i64: 9, 256>}, {transform_indices = @transform_1, window_bounds = array<i64: 1, 256>}]} {
    %c0 = arith.constant 0 : index
    %c0_0 = arith.constant 0 : index
    %0 = vector.load %arg1[%c0, %c0_0] : memref<9x256xf32, #tpu.memory_space<vmem>>, vector<9x256xf32>
    %cst = arith.constant dense<0xFF800000> : vector<256xf32>
    %1 = vector.multi_reduction <maximumf>, %0, %cst [0] : vector<9x256xf32> to vector<256xf32>
    %2 = vector.shape_cast %1 : vector<256xf32> to vector<1x256xf32>
    %c0_1 = arith.constant 0 : index
    %c0_2 = arith.constant 0 : index
    %3 = vector.load %arg2[%c0_1, %c0_2] : memref<1x256xf32, #tpu.memory_space<vmem>>, vector<1x256xf32>
    tpu.vector_store %arg2[%c0_1, %c0_2], %2 {strides = array<i32>} : memref<1x256xf32, #tpu.memory_space<vmem>>, vector<1x256xf32>,
    return
  }
  func.func @transform_0(%arg0: i32) -> (i32, i32) {
    %c0_i32 = arith.constant 0 : i32
    %c0_i32_0 = arith.constant 0 : i32
    return %c0_i32, %arg0 : i32, i32
  }
  func.func @transform_1(%arg0: i32) -> (i32, i32) {
    %c0_i32 = arith.constant 0 : i32
    %c0_i32_0 = arith.constant 0 : i32
    return %c0_i32, %arg0 : i32, i32
  }
}

</mosaic_0001>

<bundles_post_ra>
// kernel: tpu_custom_call.1
= control target key start
LH: loop header
LB: loop body
LE: loop exit
PB: predicated region body
PF: predicated region fallthrough
CT: control target
= control target key end

     0   :  { %6 = vsyncpa [#allocation3], 0  ;;  %s152_s0 = inlined_call_operand.hbm [shape: f32[9,256], index: 0, kind: input, shape index: {}]   ;;  %s153_s1 = inlined_call_operand.hbm [shape: f32[1,256], index: 1, kind: output, shape index: {}]  }
   0x1   :  { %7 = vsyncpa [#allocation4], 0  ;;  %s12_s8 = sshll.u32 %s152_s0, 4  ;;  %s129_s9 = smov [#allocation2]   ;;  %s13_s8 = int_to_ptr.hbm [resolvable:$true] %s12_s8 }
   0x2   :  { %s14_s10 = sshll.u32 %s129_s9, 4  ;;  %s130_s11 = smov 256   ;;  %s15_s10 = int_to_ptr.vmem [resolvable:$true] %s14_s10 }
   0x3   :  { %s131_s12 = smov 16  }
   0x4   :  { %20 = dma.hbm_to_vmem [thread:$0]  %s13_s8, 512, %s15_s10, [#allocation3], %s130_s11, %s130_s11, %s131_s12  }
   0x5   :  { %125 = dma.done.wait [#allocation3], 512  }
   0x6   :  { %126 = vsyncadd [#allocation3], 4294966784  ;;  %vm29_vm0 = vcmask 1040384   ;;  %v25_v0 = vld [vmem:[#allocation2] sm:$0xff]  ;;  %v26_v1 = vld [vmem:[#allocation2 + $0x8] sm:$0xff]  ;;  %v51_v18 = vlaneseq  ;;  %s132_s0 = smov [#allocation5]  }
   0x7   :  { %v27_v2 = vld [vmem:[#allocation2 + $0x10] sm:$0x1]  ;;  %v28_v3 = vld [vmem:[#allocation2 + $0x18] sm:$0x1]  ;;  %s61_s13 = sshll.u32 %s132_s0, 4  ;;  %s63_s16 = sshll.u32 %s153_s1, 4  ;;  %s62_s13 = int_to_ptr.vmem [resolvable:$true] %s61_s13  ;;  %s64_s16 = int_to_ptr.hbm [resolvable:$true] %s63_s16 }
   0x8   :  { %v30_v4 = vsel %vm29_vm0, %v27_v2, -inf  ;;  %v38_v6 = vsel %vm29_vm0, %v28_v3, -inf  ;;  %vm53_vm1 = vcmp.lt.s32.totalorder %v51_v18, 256 }
   0x9   :  { %v31_v5 = vmax.f32 %v25_v0, %v30_v4  ;;  %v39_v7 = vmax.f32 %v26_v1, %v38_v6 }
   0xb   :  { %v32_v8 = vrot.slane %v31_v5, 4  ;;  %v40_v9 = vrot.slane %v39_v7, 4 }
   0xd   :  { %v33_v10 = vmax.f32 %v31_v5, %v32_v8  ;;  %v41_v11 = vmax.f32 %v39_v7, %v40_v9 }
   0xf   :  { %v34_v12 = vrot.slane %v33_v10, 2  ;;  %v42_v13 = vrot.slane %v41_v11, 2 }
  0x11   :  { %v35_v14 = vmax.f32 %v33_v10, %v34_v12  ;;  %v43_v15 = vmax.f32 %v41_v11, %v42_v13 }
  0x13   :  { %v36_v16 = vrot.slane %v35_v14, 1  ;;  %v44_v17 = vrot.slane %v43_v15, 1 }
  0x15   :  { %v37_v19 = vmax.f32 %v35_v14, %v36_v16  ;;  %v45_v20 = vmax.f32 %v43_v15, %v44_v17 }
  0x17   :  { %v48_v21 = vrot.slane %v45_v20, 7 }
  0x19   :  { %v49_v22 = vsel %vm29_vm0, %v37_v19, %v48_v21 }
  0x1a   :  { %55 = vst.msk [vmem:[#allocation5] sm:$0x3] %vm53_vm1, %v49_v22 }
  0x1b   :  { %66 = dma.vmem_to_hbm [thread:$0]  %s62_s13, 32, %s64_s16, [#allocation4]  }
  0x1c   :  { %127 = dma.done.wait [#allocation4], 32  }
  0x1d   :  { %128 = vsyncadd [#allocation4], 4294967264 }
  0x1e   :  { %71 = vsyncpa [#allocation3], 1 }
  0x1f   :  { %72 = vsyncpa [#allocation4], 1 }

</bundles_post_ra>
